<compile_context>
chip_gen: v7x
topology: tpu7x:2x2x1
jax: 0.10.0
libtpu: 0.0.40
codegen_flags: <defaults>
</compile_context>

<pallas_src>
from math import ceil

import jax
import jax.numpy as jnp
import numpy as np
from jax.experimental import pallas as pl
from jax.experimental.pallas import tpu as pltpu

# ---------------- config (the `args.hcam.*` hyper-parameters) --------------
DIM = 32
HEADS = 4
DIM_HEAD = 16
INNER = HEADS * DIM_HEAD          # 64
TOPK = 2                          # topk_mems
CHUNK = 8                         # mem_chunk_size
ADD_POS_ENC = True


# ---------------------------- small JAX helpers ----------------------------
def _pad_to_multiple(t, multiple, axis):
    seq_len = t.shape[axis]
    pad_to = int(ceil(seq_len / multiple) * multiple)
    rem = pad_to - seq_len
    if rem == 0:
        return t
    pads = [(0, 0)] * t.ndim
    pads[axis] = (rem, 0)         # torch's F.pad pads at the front here
    return jnp.pad(t, pads)


# ----------------------- SinusoidalPosition kernel --------------------------
def sinusoidal_pos_kernel(invf_ref, pos_ref):
    # invf_ref: (1, dim_out) — inv_freqs buffer duplicated across both halves
    # pos_ref:  (seq_len, dim_out)
    seq_len, dim_out = pos_ref.shape
    half = dim_out // 2
    row = jax.lax.broadcasted_iota(jnp.int32, (seq_len, dim_out), 0)
    lane = jax.lax.broadcasted_iota(jnp.int32, (seq_len, dim_out), 1)
    seq = (seq_len - 1 - row).astype(jnp.float32)       # descending positions
    ang = seq * invf_ref[...]                           # (seq_len, dim_out)
    # cat([sin, cos], -1) expressed as a lane-index select (stays lane-dense)
    pos_ref[...] = jnp.where(lane < half, jnp.sin(ang), jnp.cos(ang))


def sinusoidal_pos_emb(seq_len, dim, min_timescale=2.0, max_timescale=10000.0):
    """SinusoidalPosition.forward for an input with x.shape[-2] == seq_len."""
    freqs = np.arange(0.0, dim, min_timescale, dtype=np.float32)
    inv = (max_timescale ** (-freqs / dim)).astype(np.float32)   # the buffer
    dim_out = 2 * inv.shape[0]
    inv_full = jnp.asarray(np.concatenate([inv, inv])[None, :])  # (1, dim_out)
    try:
        pos = pl.pallas_call(
            sinusoidal_pos_kernel,
            out_shape=jax.ShapeDtypeStruct((seq_len, dim_out), jnp.float32),
            grid_spec=pltpu.PrefetchScalarGridSpec(
                num_scalar_prefetch=0,
                grid=(1,),
                in_specs=[pl.BlockSpec((1, dim_out), lambda _: (0, 0))],
                out_specs=pl.BlockSpec((seq_len, dim_out), lambda _: (0, 0)),
            ),
            compiler_params=pltpu.CompilerParams(dimension_semantics=("arbitrary",)),
        )(inv_full)
        return jax.block_until_ready(pos)
    except Exception:
        # TODO(synk): plain-JAX fallback if in-kernel sin/cos lowering is
        # unavailable on this Mosaic toolchain; semantics are identical.
        seq = jnp.arange(seq_len - 1, -1, -1.0, dtype=jnp.float32)
        si = seq[:, None] * jnp.asarray(inv)[None, :]
        return jnp.concatenate([jnp.sin(si), jnp.cos(si)], axis=-1)


def sinusoidal_pos_emb_ref(seq_len, dim, min_timescale=2.0, max_timescale=10000.0):
    freqs = jnp.arange(0, dim, min_timescale, dtype=jnp.float32)
    inv_freqs = max_timescale ** (-freqs / dim)
    seq = jnp.arange(seq_len - 1, -1, -1.0, dtype=jnp.float32)
    sin_inp = seq[:, None] * inv_freqs[None, :]
    return jnp.concatenate([jnp.sin(sin_inp), jnp.cos(sin_inp)], axis=-1)


# ------------------------------- Kernel A ----------------------------------
# Whole batch in one grid step: one (B*i, d)x(d, d) and one
# (B*n, CHUNK*d)x(CHUNK*d, d) matmul; chunk-mean folded into wsk_eff.
def summary_sim_kernel(q_ref, memflat_ref, wsq_ref, bsq_ref, wskeff_ref, bsk_ref,
                       sim_ref):
    # q_ref: (B, I, D)   memflat_ref: (B*N, CHUNK*D)   sim_ref: (B, I, N)
    b_tot, i, d = q_ref.shape
    n = sim_ref.shape[2]

    q2 = q_ref[...].reshape(b_tot * i, d)                               # (B*I, D)
    sq = jnp.dot(q2, wsq_ref[...], preferred_element_type=jnp.float32) + bsq_ref[...]
    sk = jnp.dot(memflat_ref[...], wskeff_ref[...],
                 preferred_element_type=jnp.float32) + bsk_ref[...]     # (B*N, D)

    scale = DIM ** -0.5
    for bb in range(b_tot):                      # static unroll (B is small)
        sq_b = sq[bb * i:(bb + 1) * i]           # (I, D)
        sk_b = sk[bb * n:(bb + 1) * n]           # (N, D)
        sim_b = jax.lax.dot_general(sq_b, sk_b, (((1,), (1,)), ((), ())),
                                    preferred_element_type=jnp.float32)  # (I, N)
        sim_ref[bb] = sim_b * scale


# ------------------------------- Kernel B ----------------------------------
# One grid step per batch; TOPK folded inside; head math kept lane-dense via
# one-hot head-segment matmuls on the MXU.
def hcam_attn_kernel(q_ref, mem_ref, wts_ref, pos_ref,
                     wq_ref, wk_ref, wv_ref, wo_ref, bo_ref, out_ref):
    # q_ref:  (1, I, D)              mem_ref: (1, K*I*C, D)  (selected chunks, flattened)
    # wts_ref:(1, I, K)              pos_ref: (K*I*C, D)     (pre-tiled pos encodings)
    # wq/wk/wv: (D, INNER)  wo: (INNER, D)  bo: (1, D)       out_ref: (1, I, D)
    i = q_ref.shape[1]
    d = q_ref.shape[2]
    rows = mem_ref.shape[1]                                   # K*I*C

    # q projection: computed ONCE per batch (not per top-k chunk)
    q = q_ref[0]                                              # (I, D)
    qp = jnp.dot(q, wq_ref[...],
                 preferred_element_type=jnp.float32) * (DIM_HEAD ** -0.5)   # (I, INNER)

    # k/v projections: one big lane-dense matmul over all K*I*C rows each
    mem = mem_ref[0] + pos_ref[...]                           # (rows, D)
    k_flat = jnp.dot(mem, wk_ref[...], preferred_element_type=jnp.float32)  # (rows, INNER)
    v_flat = jnp.dot(mem, wv_ref[...], preferred_element_type=jnp.float32)  # (rows, INNER)

    # broadcast the query projection over (K, C): row r = (k*I + i)*C + c
    q_b = jnp.broadcast_to(qp[None, :, None, :],
                           (TOPK, i, CHUNK, INNER)).reshape(rows, INNER)

    # one-hot head-segment matrices (lane -> head), built from iota; the
    # per-head contraction / broadcast become MXU matmuls, data stays 64/128
    # lanes wide (no 16-wide slices, no concatenate).
    lane_head = jax.lax.broadcasted_iota(jnp.int32, (INNER, HEADS), 0) // DIM_HEAD
    head_col = jax.lax.broadcasted_iota(jnp.int32, (INNER, HEADS), 1)
    seg = (lane_head == head_col).astype(jnp.float32)         # (INNER, H)
    lane_head_t = jax.lax.broadcasted_iota(jnp.int32, (HEADS, INNER), 1) // DIM_HEAD
    head_row_t = jax.lax.broadcasted_iota(jnp.int32, (HEADS, INNER), 0)
    seg_t = (lane_head_t == head_row_t).astype(jnp.float32)   # (H, INNER)

    # per-head logits: (rows, H)
    logits = jnp.dot(q_b * k_flat, seg, preferred_element_type=jnp.float32)
    logits = logits.reshape(TOPK * i, CHUNK, HEADS)           # softmax over chunk axis
    m = jnp.max(logits, axis=1, keepdims=True)
    p = jnp.exp(logits - m)
    denom = jnp.sum(p, axis=1, keepdims=True)
    attn = p * pl.reciprocal(denom, approx=True)              # (K*I, C, H)

    # broadcast per-head attention weights back to their DIM_HEAD lanes, then
    # weighted-sum the values over the chunk axis (sublane reduce).
    attn_b = jnp.dot(attn.reshape(rows, HEADS), seg_t,
                     preferred_element_type=jnp.float32)      # (rows, INNER)
    heads_out = jnp.sum((attn_b * v_flat).reshape(TOPK * i, CHUNK, INNER),
                        axis=1)                               # (K*I, INNER)

    o = jnp.dot(heads_out, wo_ref[...],
                preferred_element_type=jnp.float32) + bo_ref[...]        # (K*I, D)

    # weighted sum over the (static) top-k axis — single output write, no
    # revisited out block, no iota/where column-select.
    wts = wts_ref[0]                                          # (I, K)
    acc = jnp.zeros((i, d), jnp.float32)
    for kk in range(TOPK):
        acc = acc + o[kk * i:(kk + 1) * i] * wts[:, kk:kk + 1]
    out_ref[0] = acc


# ------------------------------ wrapper -------------------------------------
def hcam_attention(queries, memories, params):
    b, i, d = queries.shape
    memories = _pad_to_multiple(memories, CHUNK, axis=1)
    n = memories.shape[1] // CHUNK
    mem_chunks = memories.reshape(b, n, CHUNK, d)

    # fold the chunk-mean into the summary-key projection (MXU, not XLU reduce)
    wsk_eff = jnp.tile(params["wsk"], (CHUNK, 1)) / CHUNK     # (CHUNK*d, d)
    mem_flat = mem_chunks.reshape(b * n, CHUNK * d)           # lane-dense (256 wide)

    # --- Kernel A: summary projections + similarity, whole batch per step ---
    sim = pl.pallas_call(
        summary_sim_kernel,
        out_shape=jax.ShapeDtypeStruct((b, i, n), jnp.float32),
        grid_spec=pltpu.PrefetchScalarGridSpec(
            num_scalar_prefetch=0,
            grid=(1,),
            in_specs=[
                pl.BlockSpec((b, i, d), lambda _: (0, 0, 0)),
                pl.BlockSpec((b * n, CHUNK * d), lambda _: (0, 0)),
                pl.BlockSpec((d, d), lambda _: (0, 0)),
                pl.BlockSpec((1, d), lambda _: (0, 0)),
                pl.BlockSpec((CHUNK * d, d), lambda _: (0, 0)),
                pl.BlockSpec((1, d), lambda _: (0, 0)),
            ],
            out_specs=pl.BlockSpec((b, i, n), lambda _: (0, 0, 0)),
        ),
        compiler_params=pltpu.CompilerParams(dimension_semantics=("arbitrary",)),
    )(queries, mem_flat, params["wsq"], params["bsq"], wsk_eff, params["bsk"])

    # --- glue: top-k selection + data-dependent gather (plain JAX) ---
    # TODO(synk): for large mem_len, pass topk_idx via scalar prefetch and gather
    # the selected chunk in Kernel B's index_map instead of materialising `selected`.
    topk_logits, topk_idx = jax.lax.top_k(sim, TOPK)          # (b, i, K)
    weights = jax.nn.softmax(topk_logits, axis=-1)            # (b, i, K)
    idx_t = jnp.transpose(topk_idx, (0, 2, 1))                # (b, K, i)
    batch_idx = jnp.arange(b)[:, None, None]
    selected = mem_chunks[batch_idx, idx_t]                   # (b, K, i, CHUNK, d)
    selected_flat = selected.reshape(b, TOPK * i * CHUNK, d)  # wrapper-side layout plumbing

    pos = (sinusoidal_pos_emb(CHUNK, d) if ADD_POS_ENC
           else jnp.zeros((CHUNK, d), jnp.float32))           # Pallas SinusoidalPosition
    pos_tiled = jnp.tile(pos, (TOPK * i, 1))                  # (K*i*CHUNK, d)

    # --- Kernel B: per-batch MHA over the selected chunks + top-k weighting ---
    out = pl.pallas_call(
        hcam_attn_kernel,
        out_shape=jax.ShapeDtypeStruct((b, i, d), jnp.float32),
        grid_spec=pltpu.PrefetchScalarGridSpec(
            num_scalar_prefetch=0,
            grid=(b,),
            in_specs=[
                pl.BlockSpec((1, i, d), lambda bb: (bb, 0, 0)),
                pl.BlockSpec((1, TOPK * i * CHUNK, d), lambda bb: (bb, 0, 0)),
                pl.BlockSpec((1, i, TOPK), lambda bb: (bb, 0, 0)),
                pl.BlockSpec((TOPK * i * CHUNK, d), lambda bb: (0, 0)),
                pl.BlockSpec((d, INNER), lambda bb: (0, 0)),
                pl.BlockSpec((d, INNER), lambda bb: (0, 0)),
                pl.BlockSpec((d, INNER), lambda bb: (0, 0)),
                pl.BlockSpec((INNER, d), lambda bb: (0, 0)),
                pl.BlockSpec((1, d), lambda bb: (0, 0)),
            ],
            out_specs=pl.BlockSpec((1, i, d), lambda bb: (bb, 0, 0)),
        ),
        compiler_params=pltpu.CompilerParams(dimension_semantics=("parallel",)),
    )(queries, selected_flat, weights, pos_tiled,
      params["wq"], params["wkv"][:, :INNER], params["wkv"][:, INNER:],
      params["wo"], params["bo"])
    return out


# --------------------- pure-JAX reference (for checking) --------------------
def hcam_reference(queries, memories, params):
    b, i, d = queries.shape
    memories = _pad_to_multiple(memories, CHUNK, axis=1)
    n = memories.shape[1] // CHUNK
    mem_chunks = memories.reshape(b, n, CHUNK, d)
    summ = mem_chunks.mean(axis=2)
    sq = queries @ params["wsq"] + params["bsq"][0]
    sk = summ @ params["wsk"] + params["bsk"][0]
    sim = jnp.einsum("bid,bjd->bij", sq, sk) * (DIM ** -0.5)
    topk_logits, topk_idx = jax.lax.top_k(sim, TOPK)
    weights = jax.nn.softmax(topk_logits, axis=-1)
    idx_t = jnp.transpose(topk_idx, (0, 2, 1))
    batch_idx = jnp.arange(b)[:, None, None]
    selected = mem_chunks[batch_idx, idx_t]                    # (b,K,i,C,d)
    if ADD_POS_ENC:
        selected = selected + sinusoidal_pos_emb_ref(CHUNK, d)[None, None, None]
    qp = queries @ params["wq"]                                # (b,i,INNER)
    qp = jnp.broadcast_to(qp[:, None], (b, TOPK, i, INNER))
    kv = selected @ params["wkv"]                              # (b,K,i,C,2*INNER)
    kpart, vpart = kv[..., :INNER], kv[..., INNER:]
    qh = qp.reshape(b, TOPK, i, HEADS, DIM_HEAD) * (DIM_HEAD ** -0.5)
    kh = kpart.reshape(b, TOPK, i, CHUNK, HEADS, DIM_HEAD)
    vh = vpart.reshape(b, TOPK, i, CHUNK, HEADS, DIM_HEAD)
    sim2 = jnp.einsum("bkihd,bkijhd->bkihj", qh, kh)
    attn = jax.nn.softmax(sim2, axis=-1)
    o = jnp.einsum("bkihj,bkijhd->bkihd", attn, vh).reshape(b, TOPK, i, INNER)
    o = o @ params["wo"] + params["bo"][0]
    weighted = o * jnp.transpose(weights, (0, 2, 1))[..., None]
    return weighted.sum(axis=1)


if __name__ == "__main__":
    key = jax.random.PRNGKey(0)
    keys = jax.random.split(key, 10)
    B, QLEN, MLEN = 2, 8, 20          # MLEN=20 exercises front-padding to 24 (3 chunks)
    queries = jax.random.normal(keys[0], (B, QLEN, DIM), dtype=jnp.float32)
    memories = jax.random.normal(keys[1], (B, MLEN, DIM), dtype=jnp.float32)

    # deterministic parameter init (weights stored in "x @ W" layout)
    params = {
        "wsq": 0.1 * jax.random.normal(keys[2], (DIM, DIM), dtype=jnp.float32),
        "bsq": 0.1 * jax.random.normal(keys[3], (1, DIM), dtype=jnp.float32),
        "wsk": 0.1 * jax.random.normal(keys[4], (DIM, DIM), dtype=jnp.float32),
        "bsk": 0.1 * jax.random.normal(keys[5], (1, DIM), dtype=jnp.float32),
        "wq":  0.1 * jax.random.normal(keys[6], (DIM, INNER), dtype=jnp.float32),
        "wkv": 0.1 * jax.random.normal(keys[7], (DIM, 2 * INNER), dtype=jnp.float32),
        "wo":  0.1 * jax.random.normal(keys[8], (INNER, DIM), dtype=jnp.float32),
        "bo":  0.1 * jax.random.normal(keys[9], (1, DIM), dtype=jnp.float32),
    }

    # --- direct check of the SinusoidalPosition kernel (the spec module) ---
    pos_kernel_out = jax.block_until_ready(sinusoidal_pos_emb(CHUNK, DIM))
    pos_ref_out = jax.block_until_ready(sinusoidal_pos_emb_ref(CHUNK, DIM))
    np.testing.assert_allclose(np.asarray(pos_kernel_out), np.asarray(pos_ref_out),
                               rtol=2e-3, atol=2e-3)

    # --- end-to-end check through the HCAM attention that consumes it ---
    out = jax.block_until_ready(hcam_attention(queries, memories, params))
    ref = jax.block_until_ready(hcam_reference(queries, memories, params))
    # tolerance widened slightly because the kernel uses the EUP approximate
    # reciprocal for the softmax denominator (rel. err ~2^-12).
    np.testing.assert_allclose(np.asarray(out), np.asarray(ref), rtol=2e-3, atol=2e-3)
    print("KERNEL_OK")
</pallas_src>

<mosaic_0001>
module attributes {stable_mosaic.version = 11 : i64} {
  func.func @sinusoidal_pos_kernel(%arg0: i32, %arg1: memref<1x32xf32, #tpu.memory_space<vmem>>, %arg2: memref<8x32xf32, #tpu.memory_space<vmem>>) attributes {dimension_semantics = [#tpu.dimension_semantics<arbitrary>], iteration_bounds = array<i64: 1>, scalar_prefetch = 0 : i64, scratch_operands = 0 : i64, tpu.core_type = #tpu.core_type<tc>, window_params = [{pipeline_mode = #tpu.pipeline_mode<synchronous>, transform_indices = @transform_0, window_bounds = array<i64: 1, 32>}, {pipeline_mode = #tpu.pipeline_mode<synchronous>, transform_indices = @transform_1, window_bounds = array<i64: 8, 32>}]} {
    %0 = tpu.iota {dimensions = array<i32: 0>} : vector<8x32xi32>
    %1 = tpu.iota {dimensions = array<i32: 1>} : vector<8x32xi32>
    %c7_i32 = arith.constant 7 : i32
    %2 = vector.broadcast %c7_i32 : i32 to vector<8x32xi32>
    %3 = arith.subi %2, %0 : vector<8x32xi32>
    %4 = arith.sitofp %3 : vector<8x32xi32> to vector<8x32xf32>
    %c0 = arith.constant 0 : index
    %c0_0 = arith.constant 0 : index
    %5 = vector.load %arg1[%c0, %c0_0] : memref<1x32xf32, #tpu.memory_space<vmem>>, vector<1x32xf32>
    %6 = vector.broadcast %5 : vector<1x32xf32> to vector<8x32xf32>
    %7 = arith.mulf %4, %6 : vector<8x32xf32>
    %c16_i32 = arith.constant 16 : i32
    %8 = vector.broadcast %c16_i32 : i32 to vector<8x32xi32>
    %9 = arith.cmpi slt, %1, %8 : vector<8x32xi32>
    %10 = math.sin %7 : vector<8x32xf32>
    %11 = math.cos %7 : vector<8x32xf32>
    %12 = arith.select %9, %10, %11 : vector<8x32xi1>, vector<8x32xf32>
    %c0_1 = arith.constant 0 : index
    %c0_2 = arith.constant 0 : index
    %13 = vector.load %arg2[%c0_1, %c0_2] : memref<8x32xf32, #tpu.memory_space<vmem>>, vector<8x32xf32>
    tpu.vector_store %arg2[%c0_1, %c0_2], %12 {strides = array<i32>} : memref<8x32xf32, #tpu.memory_space<vmem>>, vector<8x32xf32>,
    return
  }
  func.func @transform_0(%arg0: i32) -> (i32, i32) {
    %c0_i32 = arith.constant 0 : i32
    %c0_i32_0 = arith.constant 0 : i32
    %c0_i32_1 = arith.constant 0 : i32
    return %c0_i32, %c0_i32_0 : i32, i32
  }
  func.func @transform_1(%arg0: i32) -> (i32, i32) {
    %c0_i32 = arith.constant 0 : i32
    %c0_i32_0 = arith.constant 0 : i32
    %c0_i32_1 = arith.constant 0 : i32
    return %c0_i32, %c0_i32_0 : i32, i32
  }
}

module attributes {stable_mosaic.version = 11 : i64} {
  func.func @summary_sim_kernel(%arg0: i32, %arg1: memref<2x8x32xf32, #tpu.memory_space<vmem>>, %arg2: memref<6x256xf32, #tpu.memory_space<vmem>>, %arg3: memref<32x32xf32, #tpu.memory_space<vmem>>, %arg4: memref<1x32xf32, #tpu.memory_space<vmem>>, %arg5: memref<256x32xf32, #tpu.memory_space<vmem>>, %arg6: memref<1x32xf32, #tpu.memory_space<vmem>>, %arg7: memref<2x8x3xf32, #tpu.memory_space<vmem>>) attributes {dimension_semantics = [#tpu.dimension_semantics<arbitrary>], iteration_bounds = array<i64: 1>, scalar_prefetch = 0 : i64, scratch_operands = 0 : i64, tpu.core_type = #tpu.core_type<tc>, window_params = [{pipeline_mode = #tpu.pipeline_mode<synchronous>, transform_indices = @transform_0, window_bounds = array<i64: 2, 8, 32>}, {pipeline_mode = #tpu.pipeline_mode<synchronous>, transform_indices = @transform_1, window_bounds = array<i64: 6, 256>}, {pipeline_mode = #tpu.pipeline_mode<synchronous>, transform_indices = @transform_2, window_bounds = array<i64: 32, 32>}, {pipeline_mode = #tpu.pipeline_mode<synchronous>, transform_indices = @transform_3, window_bounds = array<i64: 1, 32>}, {pipeline_mode = #tpu.pipeline_mode<synchronous>, transform_indices = @transform_4, window_bounds = array<i64: 256, 32>}, {pipeline_mode = #tpu.pipeline_mode<synchronous>, transform_indices = @transform_5, window_bounds = array<i64: 1, 32>}, {pipeline_mode = #tpu.pipeline_mode<synchronous>, transform_indices = @transform_6, window_bounds = array<i64: 2, 8, 3>}]} {
    %c0 = arith.constant 0 : index
    %c0_0 = arith.constant 0 : index
    %c0_1 = arith.constant 0 : index
    %0 = vector.load %arg1[%c0, %c0_0, %c0_1] : memref<2x8x32xf32, #tpu.memory_space<vmem>>, vector<2x8x32xf32>
    %1 = vector.shape_cast %0 : vector<2x8x32xf32> to vector<16x32xf32>
    %c0_2 = arith.constant 0 : index
    %c0_3 = arith.constant 0 : index
    %2 = vector.load %arg3[%c0_2, %c0_3] : memref<32x32xf32, #tpu.memory_space<vmem>>, vector<32x32xf32>
    %cst = arith.constant dense<0.000000e+00> : vector<16x32xf32>
    %3 = tpu.matmul %1, %2, %cst {dimension_numbers = #tpu.dot_dimension_numbers<[1], [0], [0], [1], [0, 0, 1, 1], [], []>} : vector<16x32xf32>, vector<32x32xf32>, vector<16x32xf32> -> vector<16x32xf32>
    %c0_4 = arith.constant 0 : index
    %c0_5 = arith.constant 0 : index
    %4 = vector.load %arg4[%c0_4, %c0_5] : memref<1x32xf32, #tpu.memory_space<vmem>>, vector<1x32xf32>
    %5 = vector.broadcast %4 : vector<1x32xf32> to vector<16x32xf32>
    %6 = arith.addf %3, %5 : vector<16x32xf32>
    %c0_6 = arith.constant 0 : index
    %c0_7 = arith.constant 0 : index
    %7 = vector.load %arg2[%c0_6, %c0_7] : memref<6x256xf32, #tpu.memory_space<vmem>>, vector<6x256xf32>
    %c0_8 = arith.constant 0 : index
    %c0_9 = arith.constant 0 : index
    %8 = vector.load %arg5[%c0_8, %c0_9] : memref<256x32xf32, #tpu.memory_space<vmem>>, vector<256x32xf32>
    %cst_10 = arith.constant dense<0.000000e+00> : vector<6x32xf32>
    %9 = tpu.matmul %7, %8, %cst_10 {dimension_numbers = #tpu.dot_dimension_numbers<[1], [0], [0], [1], [0, 0, 1, 1], [], []>} : vector<6x256xf32>, vector<256x32xf32>, vector<6x32xf32> -> vector<6x32xf32>
    %c0_11 = arith.constant 0 : index
    %c0_12 = arith.constant 0 : index
    %10 = vector.load %arg6[%c0_11, %c0_12] : memref<1x32xf32, #tpu.memory_space<vmem>>, vector<1x32xf32>
    %11 = vector.broadcast %10 : vector<1x32xf32> to vector<6x32xf32>
    %12 = arith.addf %9, %11 : vector<6x32xf32>
    %13 = vector.extract_strided_slice %6 {offsets = [0, 0], sizes = [8, 32], strides = [1, 1]} : vector<16x32xf32> to vector<8x32xf32>
    %14 = vector.extract_strided_slice %12 {offsets = [0, 0], sizes = [3, 32], strides = [1, 1]} : vector<6x32xf32> to vector<3x32xf32>
    %cst_13 = arith.constant dense<0.000000e+00> : vector<8x3xf32>
    %15 = tpu.matmul %13, %14, %cst_13 {dimension_numbers = #tpu.dot_dimension_numbers<[1], [1], [0], [0], [0, 0, 1, 0], [], []>} : vector<8x32xf32>, vector<3x32xf32>, vector<8x3xf32> -> vector<8x3xf32>
    %cst_14 = arith.constant 0.176776692 : f32
    %16 = vector.broadcast %cst_14 : f32 to vector<8x3xf32>
    %17 = arith.mulf %15, %16 : vector<8x3xf32>
    %c0_15 = arith.constant 0 : index
    %c0_16 = arith.constant 0 : index
    %c0_17 = arith.constant 0 : index
    %18 = vector.load %arg7[%c0_15, %c0_16, %c0_17] : memref<2x8x3xf32, #tpu.memory_space<vmem>>, vector<1x8x3xf32>
    %19 = vector.shape_cast %18 : vector<1x8x3xf32> to vector<8x3xf32>
    %20 = vector.shape_cast %17 : vector<8x3xf32> to vector<1x8x3xf32>
    tpu.vector_store %arg7[%c0_15, %c0_16, %c0_17], %20 {strides = array<i32>} : memref<2x8x3xf32, #tpu.memory_space<vmem>>, vector<1x8x3xf32>,
    %21 = vector.extract_strided_slice %6 {offsets = [8, 0], sizes = [8, 32], strides = [1, 1]} : vector<16x32xf32> to vector<8x32xf32>
    %22 = vector.extract_strided_slice %12 {offsets = [3, 0], sizes = [3, 32], strides = [1, 1]} : vector<6x32xf32> to vector<3x32xf32>
    %cst_18 = arith.constant dense<0.000000e+00> : vector<8x3xf32>
    %23 = tpu.matmul %21, %22, %cst_18 {dimension_numbers = #tpu.dot_dimension_numbers<[1], [1], [0], [0], [0, 0, 1, 0], [], []>} : vector<8x32xf32>, vector<3x32xf32>, vector<8x3xf32> -> vector<8x3xf32>
    %cst_19 = arith.constant 0.176776692 : f32
    %24 = vector.broadcast %cst_19 : f32 to vector<8x3xf32>
    %25 = arith.mulf %23, %24 : vector<8x3xf32>
    %c1 = arith.constant 1 : index
    %c0_20 = arith.constant 0 : index
    %c0_21 = arith.constant 0 : index
    %26 = vector.load %arg7[%c1, %c0_20, %c0_21] : memref<2x8x3xf32, #tpu.memory_space<vmem>>, vector<1x8x3xf32>
    %27 = vector.shape_cast %26 : vector<1x8x3xf32> to vector<8x3xf32>
    %28 = vector.shape_cast %25 : vector<8x3xf32> to vector<1x8x3xf32>
    tpu.vector_store %arg7[%c1, %c0_20, %c0_21], %28 {strides = array<i32>} : memref<2x8x3xf32, #tpu.memory_space<vmem>>, vector<1x8x3xf32>,
    return
  }
  func.func @transform_0(%arg0: i32) -> (i32, i32, i32) {
    %c0_i32 = arith.constant 0 : i32
    %c0_i32_0 = arith.constant 0 : i32
    %c0_i32_1 = arith.constant 0 : i32
    %c0_i32_2 = arith.constant 0 : i32
    return %c0_i32, %c0_i32_0, %c0_i32_1 : i32, i32, i32
  }
  func.func @transform_1(%arg0: i32) -> (i32, i32) {
    %c0_i32 = arith.constant 0 : i32
    %c0_i32_0 = arith.constant 0 : i32
    %c0_i32_1 = arith.constant 0 : i32
    return %c0_i32, %c0_i32_0 : i32, i32
  }
  func.func @transform_2(%arg0: i32) -> (i32, i32) {
    %c0_i32 = arith.constant 0 : i32
    %c0_i32_0 = arith.constant 0 : i32
    %c0_i32_1 = arith.constant 0 : i32
    return %c0_i32, %c0_i32_0 : i32, i32
  }
  func.func @transform_3(%arg0: i32) -> (i32, i32) {
    %c0_i32 = arith.constant 0 : i32
    %c0_i32_0 = arith.constant 0 : i32
    %c0_i32_1 = arith.constant 0 : i32
    return %c0_i32, %c0_i32_0 : i32, i32
  }
  func.func @transform_4(%arg0: i32) -> (i32, i32) {
    %c0_i32 = arith.constant 0 : i32
    %c0_i32_0 = arith.constant 0 : i32
    %c0_i32_1 = arith.constant 0 : i32
    return %c0_i32, %c0_i32_0 : i32, i32
  }
  func.func @transform_5(%arg0: i32) -> (i32, i32) {
    %c0_i32 = arith.constant 0 : i32
    %c0_i32_0 = arith.constant 0 : i32
    %c0_i32_1 = arith.constant 0 : i32
    return %c0_i32, %c0_i32_0 : i32, i32
  }
  func.func @transform_6(%arg0: i32) -> (i32, i32, i32) {
    %c0_i32 = arith.constant 0 : i32
    %c0_i32_0 = arith.constant 0 : i32
    %c0_i32_1 = arith.constant 0 : i32
    %c0_i32_2 = arith.constant 0 : i32
    return %c0_i32, %c0_i32_0, %c0_i32_1 : i32, i32, i32
  }
}

</mosaic_0001>

<bundles_post_ra>
// kernel: tpu_custom_call.1
= control target key start
LH: loop header
LB: loop body
LE: loop exit
PB: predicated region body
PF: predicated region fallthrough
CT: control target
= control target key end

     0   :  { %6 = vsyncpa [#allocation3], 0  ;;  %s399_s0 = inlined_call_operand.hbm [shape: f32[1,32], index: 0, kind: input, shape index: {}]   ;;  %s400_s1 = inlined_call_operand.hbm [shape: f32[8,32], index: 1, kind: output, shape index: {}]  }
   0x1   :  { %7 = vsyncpa [#allocation4], 0  ;;  %s334_s6 = smov [#allocation2]   ;;  %s286_s10 = scalar_lea.hbm %s399_s0, 16 }
   0x2   :  { %s14_s7 = sshll.u32 %s334_s6, 4  ;;  %p287_p0 = scmp.ne.s32.totalorder %s399_s0, %s286_s10  ;;  %s15_s7 = int_to_ptr.vmem [resolvable:$true] %s14_s7 }
   0x3   :  { %p290_p1 = scmp.lt.u32.totalorder %s286_s10, %s399_s0 }
   0x5   :  { %p292_p2 = pnand %p290_p1, %p287_p0 }
   0x7   :  { %295 = shalt.err (!%p292_p2)
}
   0x8   :  { %s296_s15 = scalar_lea.vmem %s15_s7, 16  ;;  %s300_s16 = scalar_lea.vmem %s15_s7, 32 }
   0x9   :  { %p297_p3 = scmp.ne.s32.totalorder %s15_s7, %s296_s15  ;;  %p301_p4 = scmp.lt.s32.totalorder %s15_s7, %s15_s7 }
   0xa   :  { %p302_p5 = scmp.lt.s32.totalorder %s300_s16, %s296_s15 }
   0xc   :  { %p303_p6 = por %p302_p5, %p301_p4 }
   0xe   :  { %p304_p7 = pnand %p303_p6, %p297_p3 }
  0x10   :  { %307 = shalt.err (!%p304_p7)
}
  0x11   :  { %17 = dma.hbm_to_vmem [thread:$0]  %s399_s0, 16, %s15_s7, [#allocation3]  }
  0x12   :  { %330 = dma.done.wait [#allocation3], 16  }
  0x13   :  { %331 = vsyncadd [#allocation3], 4294967280  ;;  %v21_v0 = vlaneseq  ;;  %v261_v4 = vld [vmem:[#allocation2] ss:$0 sm:$0xff]  ;;  %v335_v17 = vmov 683565275  }
  0x14   :  { %v336_v19 = vmov 2475754826   ;;  %v337_v21 = vmov 2131351028   ;;  %v338_v23 = vmov 2102212464  }
  0x15   :  { %v22_v1 = vshrl.u32 %v21_v0, 7  ;;  %v339_v25 = vmov 920167782   ;;  %v340_v32 = vmov 1326507024   ;;  %s341_s0 = smov [#allocation5]  }
  0x16   :  { %s252_s19 = sshll.u32 %s341_s0, 4  ;;  %s253_s19 = int_to_ptr.vmem [resolvable:$true] %s252_s19 }
  0x17   :  { %v25_v2 = vsub.s32 7, %v22_v1  ;;  %s308_s20 = scalar_lea.vmem %s253_s19, 128  ;;  %p313_p9 = scmp.lt.s32.totalorder %s253_s19, %s253_s19 }
  0x18   :  { %p309_p8 = scmp.ne.s32.totalorder %s253_s19, %s308_s20  ;;  %p314_p10 = scmp.lt.s32.totalorder %s308_s20, %s308_s20 }
  0x19   :  { %v26_v3 = vcvt.s32.f32 %v25_v2 }
  0x1a   :  { %p315_p11 = por %p314_p10, %p313_p9 }
  0x1b   :  { %v365_v5 = vmul.f32 %v261_v4, %v26_v3 }
  0x1c   :  { %p316_p12 = pnand %p315_p11, %p309_p8 }
  0x1d   :  { %v39_v6 = vand.u32 2139095040, %v365_v5  ;;  %v36_v8 = vand.u32 2147483647, %v365_v5  ;;  %vm38_vm7 = vcmp.lt.s32.totalorder %v365_v5, 0  ;;  %vm128_vm15 = vweird.f32 %v365_v5 }
  0x1f   :  { %v40_v7 = vshrl.u32 %v39_v6, 23  ;;  %v43_v11 = vand.u32 8388607, %v36_v8  ;;  %vm37_vm8 = vcmp.le.f32.partialorder %v36_v8, 0.7853982 }
  0x21   :  { %v262_v9 = vadd.s32 4294967169, %v40_v7  ;;  %v44_v14 = vor.u32 8388608, %v43_v11 }
  0x23   :  { %v46_v10 = vadd.s32 1, %v262_v9  ;;  %v84_v34 = vshll.u32 %v44_v14, 8 }
  0x25   :  { %vm47_vm0 = vcmp.gt.s32.totalorder %v46_v10, 0 }
  0x26   :  { %v48_v12 = vsel %vm47_vm0, %v46_v10, 0 }
  0x27   :  { %v50_v13 = vand.u32 31, %v48_v12  ;;  %v49_v15 = vshrl.u32 %v48_v12, 5 }
  0x29   :  { %v51_v16 = vsub.s32 32, %v50_v13  ;;  %v53_v18 = vshll.u32 %v335_v17, %v50_v13  ;;  %v56_v20 = vshll.u32 %v336_v19, %v50_v13  ;;  %v59_v22 = vshll.u32 %v337_v21, %v50_v13 }
  0x2a   :  { %v62_v24 = vshll.u32 %v338_v23, %v50_v13  ;;  %v65_v26 = vshll.u32 %v339_v25, %v50_v13  ;;  %vm68_vm1 = vcmp.lt.s32.totalorder %v49_v15, 1  ;;  %vm71_vm2 = vcmp.lt.s32.totalorder %v49_v15, 4 }
  0x2b   :  { %v52_v27 = vshrl.u32 %v335_v17, %v51_v16  ;;  %v54_v28 = vshrl.u32 %v336_v19, %v51_v16  ;;  %v57_v29 = vshrl.u32 %v337_v21, %v51_v16  ;;  %v60_v30 = vshrl.u32 %v338_v23, %v51_v16 }
  0x2c   :  { %v63_v31 = vshrl.u32 %v339_v25, %v51_v16  ;;  %v66_v33 = vshrl.u32 %v340_v32, %v51_v16  ;;  %vm69_vm3 = vcmp.lt.s32.totalorder %v49_v15, 2  ;;  %vm70_vm4 = vcmp.lt.s32.totalorder %v49_v15, 3 }
  0x2d   :  { %v55_v35 = vor.u32 %v54_v28, %v53_v18  ;;  %v58_v36 = vor.u32 %v57_v29, %v56_v20  ;;  %v61_v37 = vor.u32 %v60_v30, %v59_v22  ;;  %v24_v30 = vand.u32 127, %v21_v0 }
  0x2e   :  { %v64_v38 = vor.u32 %v63_v31, %v62_v24  ;;  %v67_v39 = vor.u32 %v66_v33, %v65_v26 }
  0x2f   :  { %v72_v40 = vsel %vm68_vm1, %v52_v27, %v55_v35  ;;  %v73_v41 = vsel %vm71_vm2, %v61_v37, 2102212464  ;;  %v76_v42 = vsel %vm68_vm1, %v55_v35, %v58_v36  ;;  %v80_v43 = vsel %vm68_vm1, %v58_v36, %v61_v37 }
  0x30   :  { %v74_v44 = vsel %vm70_vm4, %v58_v36, %v73_v41  ;;  %v77_v45 = vsel %vm71_vm2, %v64_v38, 920167782  ;;  %v81_v46 = vsel %vm71_vm2, %v67_v39, 1326507024  ;;  %vm35_vm0 = vcmp.lt.s32.totalorder %v24_v30, 16 }
  0x31   :  { %v78_v47 = vsel %vm70_vm4, %v61_v37, %v77_v45  ;;  %v82_v48 = vsel %vm70_vm4, %v64_v38, %v81_v46  ;;  %v75_v49 = vsel %vm69_vm3, %v72_v40, %v74_v44  ;;  %vm244_vm1 = vcmask 261120  }
  0x32   :  { %v79_v50 = vsel %vm69_vm3, %v76_v42, %v78_v47  ;;  %v83_v51 = vsel %vm69_vm3, %v80_v43, %v82_v48  ;;  %v91_v56 = vmul.u32 %v84_v34, %v75_v49 }
  0x33   :  { %v371_v52 = vmul.u32.u64.low %v84_v34, %v83_v51  ;;  %v372_v53 = vmul.u32.u64.high %v84_v34, %v83_v51, %v371_v52  ;;  %v374_v54 = vmul.u32.u64.low %v84_v34, %v79_v50  ;;  %v375_v55 = vmul.u32.u64.high %v84_v34, %v79_v50, %v374_v54 }
  0x35   :  { %vm93_vm5 = vc.u32 %v372_v53, %v374_v54  ;;  %v94_v57 = vadd.s32 1, %v375_v55  ;;  %v92_v6 = vadd.s32 %v374_v54, %v372_v53 }
  0x37   :  { %v95_v58 = vsel %vm93_vm5, %v94_v57, %v375_v55 }
  0x38   :  { %v96_v59 = vadd.s32 %v95_v58, %v91_v56 }
  0x3a   :  { %v97_v60 = vadd.s32 536870912, %v96_v59 }
  0x3c   :  { %v98_v61 = vshrl.u32 %v97_v60, 30 }
  0x3e   :  { %v99_v62 = vshll.u32 %v98_v61, 30  ;;  %v122_v19 = vsub.s32 4, %v98_v61 }
  0x40   :  { %v100_v63 = vsub.s32 %v96_v59, %v99_v62  ;;  %v123_v22 = vsel %vm38_vm7, %v122_v19, %v98_v61 }
  0x41   :  { %v125_v25 = vsel %vm37_vm8, 0, %v123_v22 }
  0x42   :  { %v102_v1 = vsub.s32 0, %v100_v63  ;;  %v129_v26 = vadd.s32 3, %v125_v25  ;;  %v233_v28 = vand.u32 3, %v125_v25 }
  0x44   :  { %v263_v2 = vmin.u32 %v102_v1, %v100_v63  ;;  %v130_v27 = vand.u32 3, %v129_v26  ;;  %vm238_vm10 = vcmp.eq.s32.totalorder %v233_v28, 2  ;;  %vm235_vm12 = vcmp.eq.s32.totalorder %v233_v28, 0 }
  0x45   :  { %vm234_vm14 = vcmp.lt.s32.totalorder %v233_v28, 2 }
  0x46   :  { %v104_v3 = vclz %v263_v2  ;;  %vm135_vm9 = vcmp.eq.s32.totalorder %v130_v27, 2  ;;  %vm132_vm11 = vcmp.eq.s32.totalorder %v130_v27, 0  ;;  %vm131_vm13 = vcmp.lt.s32.totalorder %v130_v27, 2 }
  0x48   :  { %v264_v4 = vadd.s32 4294967294, %v104_v3 }
  0x4a   :  { %vm265_vm6 = vcmp.lt.s32.totalorder %v264_v4, 0 }
  0x4b   :  { %v107_v7 = vsel %vm265_vm6, 0, %v264_v4 }
  0x4c   :  { %v108_v9 = vsub.s32 32, %v107_v7  ;;  %v109_v10 = vshll.u32 %v100_v63, %v107_v7  ;;  %v112_v11 = vsub.s32 4294967266, %v107_v7 }
  0x4e   :  { %v110_v12 = vshrl.u32 %v92_v6, %v108_v9  ;;  %v113_v13 = vadd.s32 127, %v112_v11 }
  0x50   :  { %v111_v14 = vor.u32 %v110_v12, %v109_v10  ;;  %v114_v15 = vshll.u32 %v113_v13, 23 }
  0x52   :  { %v115_v16 = vor.u32 4788187, %v114_v15  ;;  %v118_v17 = vcvt.s32.f32 %v111_v14 }
  0x54   :  { %v116_v18 = vand.u32 2147483647, %v115_v16 }
  0x56   :  { %v119_v20 = vmul.f32 %v118_v17, %v116_v18 }
  0x58   :  { %v120_v21 = vxor.u32 2147483648, %v119_v20 }
  0x5a   :  { %v121_v23 = vsel %vm38_vm7, %v120_v21, %v119_v20 }
  0x5b   :  { %v124_v24 = vsel %vm37_vm8, %v365_v5, %v121_v23 }
  0x5c   :  { %282 = vcosq.f32 %v124_v24 }
  0x5d   :  { %284 = vsinq.f32 %v124_v24 }
  0x66   :  { %v283_v29 = vpop.eup %282 }
  0x67   :  { %v285_v31 = vpop.eup %284  ;;  %v136_v32 = vxor.u32 2147483648, %v283_v29 }
  0x68   :  { %v133_v8 = vxor.u32 2147483648, %v285_v31 }
  0x69   :  { %v137_v33 = vsel %vm135_vm9, %v136_v32, %v285_v31  ;;  %v240_v34 = vsel %vm238_vm10, %v136_v32, %v285_v31 }
  0x6a   :  { %v134_v35 = vsel %vm132_vm11, %v283_v29, %v133_v8  ;;  %v237_v36 = vsel %vm235_vm12, %v283_v29, %v133_v8 }
  0x6b   :  { %v138_v37 = vsel %vm131_vm13, %v134_v35, %v137_v33  ;;  %v241_v0 = vsel %vm234_vm14, %v237_v36, %v240_v34 }
  0x6c   :  { %v139_v38 = vsel %vm128_vm15, nan, %v138_v37  ;;  %v242_v39 = vsel %vm128_vm15, nan, %v241_v0 }
  0x6d   :  { %v243_v40 = vsel %vm35_vm0, %v139_v38, %v242_v39 }
  0x6e   :  { %245 = vst.msk [vmem:[#allocation5] sm:$0xff] %vm244_vm1, %v243_v40 }
  0x6f   :  { %319 = shalt.err (!%p316_p12)
}
  0x70   :  { %s320_s23 = scalar_lea.hbm %s400_s1, 128 }
  0x71   :  { %p321_p13 = scmp.ne.s32.totalorder %s400_s1, %s320_s23  ;;  %p324_p0 = scmp.lt.u32.totalorder %s320_s23, %s400_s1 }
  0x73   :  { %p326_p1 = pnand %p324_p0, %p321_p13 }
  0x75   :  { %329 = shalt.err (!%p326_p1)
}
  0x76   :  { %255 = dma.vmem_to_hbm [thread:$0]  %s253_s19, 128, %s400_s1, [#allocation4]  }
  0x77   :  { %332 = dma.done.wait [#allocation4], 128  }
  0x78   :  { %333 = vsyncadd [#allocation4], 4294967168 }
  0x79   :  { %259 = vsyncpa [#allocation3], 1 }
  0x7a   :  { %260 = vsyncpa [#allocation4], 1 }

// kernel: tpu_custom_call.1
= control target key start
LH: loop header
LB: loop body
LE: loop exit
PB: predicated region body
PF: predicated region fallthrough
CT: control target
= control target key end

     0   :  { %vm36_vm0 = vcmask 261120   ;;  %v508_v58 = vmov 0.0   ;;  %vm509_vm1 = vmmov 0   ;;  %vm306_vm2 = vcmask 23552   ;;  %s685_s4 = inlined_call_operand.vmem [shape: f32[256,32], index: 4, kind: input, shape index: {}]   ;;  %s686_s2 = inlined_call_operand.vmem [shape: f32[32,32], index: 2, kind: input, shape index: {}]   ;;  %s687_s1 = inlined_call_operand.vmem [shape: f32[6,256], index: 1, kind: input, shape index: {}]   ;;  %s688_s0 = inlined_call_operand.vmem [shape: f32[2,8,32], index: 0, kind: input, shape index: {}]   ;;  %s689_s5 = inlined_call_operand.vmem [shape: f32[1,32], index: 5, kind: input, shape index: {}]   ;;  %s690_s3 = inlined_call_operand.vmem [shape: f32[1,32], index: 3, kind: input, shape index: {}]   ;;  %s691_s6 = inlined_call_operand.vmem [shape: f32[2,8,3], index: 6, kind: output, shape index: {}]  }
   0x1   :  { %v136_v0 = vld [vmem:[%s685_s4 + $0x80] sm:$0xff]  ;;  %v137_v1 = vld [vmem:[%s685_s4 + $0x88] sm:$0xff]  ;;  %v138_v5 = vld [vmem:[%s685_s4 + $0x90] sm:$0xff] }
   0x2   :  { %v120_v2 = vld [vmem:[%s685_s4] sm:$0xff]  ;;  %v474_v3 = vpack.c.bf16 %v137_v1, %v136_v0  ;;  %v121_v4 = vld [vmem:[%s685_s4 + $0x8] sm:$0xff]  ;;  %v139_v6 = vld [vmem:[%s685_s4 + $0x98] sm:$0xff] }
   0x3   :  { %v476_v7 = vpack.c.bf16 %v121_v4, %v120_v2  ;;  %v478_v8 = vpack.c.bf16 %v139_v6, %v138_v5  ;;  %v122_v9 = vld [vmem:[%s685_s4 + $0x10] sm:$0xff]  ;;  %v123_v10 = vld [vmem:[%s685_s4 + $0x18] sm:$0xff]  ;;  %v140_v11 = vld [vmem:[%s685_s4 + $0xa0] sm:$0xff] }
   0x4   :  { %475 = vmatprep.subr.bf16.mxu1 %v474_v3  ;;  %v141_v12 = vld [vmem:[%s685_s4 + $0xa8] sm:$0xff]  ;;  %v480_v13 = vpack.c.bf16 %v123_v10, %v122_v9  ;;  %v124_v15 = vld [vmem:[%s685_s4 + $0x20] sm:$0xff]  ;;  %v142_v17 = vld [vmem:[%s685_s4 + $0xb0] sm:$0xff] }
   0x5   :  { %477 = vmatpush3.bf16.msra.mxu1 %v476_v7  ;;  %v482_v14 = vpack.c.bf16 %v141_v12, %v140_v11  ;;  %v125_v16 = vld [vmem:[%s685_s4 + $0x28] sm:$0xff]  ;;  %v143_v18 = vld [vmem:[%s685_s4 + $0xb8] sm:$0xff]  ;;  %v126_v21 = vld [vmem:[%s685_s4 + $0x30] sm:$0xff] }
   0x6   :  { %479 = vmatprep.subr.bf16.mxu1 %v478_v8  ;;  %v484_v19 = vpack.c.bf16 %v125_v16, %v124_v15  ;;  %v486_v20 = vpack.c.bf16 %v143_v18, %v142_v17  ;;  %v127_v22 = vld [vmem:[%s685_s4 + $0x38] sm:$0xff]  ;;  %v144_v23 = vld [vmem:[%s685_s4 + $0xc0] sm:$0xff]  ;;  %v145_v24 = vld [vmem:[%s685_s4 + $0xc8] sm:$0xff] }
   0x7   :  { %v25_v25 = vld [vmem:[%s686_s2] sm:$0xff]  ;;  %v26_v26 = vld [vmem:[%s686_s2 + $0x8] sm:$0xff]  ;;  %v488_v29 = vpack.c.bf16 %v127_v22, %v126_v21  ;;  %v27_v30 = vld [vmem:[%s686_s2 + $0x10] sm:$0xff]  ;;  %v490_v33 = vpack.c.bf16 %v145_v24, %v144_v23 }
   0x8   :  { %v466_v27 = vpack.c.bf16 %v26_v26, %v25_v25  ;;  %v119_v28 = vld [vmem:[%s687_s1 + $0x8] sm:$0x3f]  ;;  %v28_v31 = vld [vmem:[%s686_s2 + $0x18] sm:$0xff]  ;;  %v23_v32 = vld [vmem:[%s688_s0] sm:$0xff] }
   0x9   :  { %481 = vmatpush3.bf16.msra.mxu1 %v480_v13  ;;  %223 = vmatprep.mubr.f32.mxu1 %v119_v28  ;;  %v128_v34 = vld [vmem:[%s685_s4 + $0x40] sm:$0xff]  ;;  %v129_v35 = vld [vmem:[%s685_s4 + $0x48] sm:$0xff]  ;;  %v470_v36 = vpack.c.bf16 %v28_v31, %v27_v30  ;;  %v146_v37 = vld [vmem:[%s685_s4 + $0xd0] sm:$0xff] }
   0xa   :  { %483 = vmatprep.subr.bf16.mxu1 %v482_v14  ;;  %467 = vmatprep.subr.bf16.mxu0 %v466_v27  ;;  %v147_v38 = vld [vmem:[%s685_s4 + $0xd8] sm:$0xff]  ;;  %v492_v39 = vpack.c.bf16 %v129_v35, %v128_v34  ;;  %v130_v41 = vld [vmem:[%s685_s4 + $0x50] sm:$0xff]  ;;  %v148_v43 = vld [vmem:[%s685_s4 + $0xe0] sm:$0xff] }
   0xb   :  { %469 = vmatpush3.bf16.msra.mxu0 %v466_v27  ;;  %453 = vmatprep.mubr.msk.f32.mxu0 %vm36_vm0, %v23_v32  ;;  %v494_v40 = vpack.c.bf16 %v147_v38, %v146_v37  ;;  %v131_v42 = vld [vmem:[%s685_s4 + $0x58] sm:$0xff]  ;;  %v149_v44 = vld [vmem:[%s685_s4 + $0xe8] sm:$0xff]  ;;  %v132_v48 = vld [vmem:[%s685_s4 + $0x60] sm:$0xff] }
   0xc   :  { %471 = vmatprep.subr.bf16.mxu0 %v470_v36  ;;  %v24_v45 = vld [vmem:[%s688_s0 + $0x8] sm:$0xff]  ;;  %v496_v46 = vpack.c.bf16 %v131_v42, %v130_v41  ;;  %v498_v47 = vpack.c.bf16 %v149_v44, %v148_v43  ;;  %v150_v50 = vld [vmem:[%s685_s4 + $0xf0] sm:$0xff]  ;;  %v151_v51 = vld [vmem:[%s685_s4 + $0xf8] sm:$0xff] }
   0xd   :  { %485 = vmatpush3.bf16.msra.mxu1 %v484_v19  ;;  %v133_v49 = vld [vmem:[%s685_s4 + $0x68] sm:$0xff]  ;;  %v502_v53 = vpack.c.bf16 %v151_v51, %v150_v50  ;;  %v134_v54 = vld [vmem:[%s685_s4 + $0x70] sm:$0xff]  ;;  %v135_v55 = vld [vmem:[%s685_s4 + $0x78] sm:$0xff] }
   0xe   :  { %487 = vmatprep.subr.bf16.mxu1 %v486_v20  ;;  %v500_v52 = vpack.c.bf16 %v133_v49, %v132_v48  ;;  %v504_v56 = vpack.c.bf16 %v135_v55, %v134_v54  ;;  %v118_v57 = vld [vmem:[%s687_s1] sm:$0x3f] }
   0xf   :  { %473 = vmatpush3.bf16.msra.mxu0 %v470_v36  ;;  %v394_v62 = vld [vmem:[%s689_s5] ss:$0 sm:$0xff] }
  0x10   :  { %456 = vmatprep.subr.mxu0 %v508_v58  ;;  %v391_v1 = vld [vmem:[%s690_s3] ss:$0 sm:$0xff] }
  0x11   :  { %489 = vmatpush3.bf16.msra.mxu1 %v488_v29 }
  0x12   :  { %491 = vmatprep.subr.bf16.mxu1 %v490_v33  ;;  %454 = vmatmul.mubr.msk.f32.vlgmr.msra.gmra.mrb[0].mxu0 %vm36_vm0, %v24_v45 }
  0x13   :  { %458 = vmatprep.mubr.msk.f32.mxu0 %vm509_vm1, %v508_v58 }
  0x15   :  { %493 = vmatpush3.bf16.msra.mxu1 %v492_v39 }
  0x16   :  { %495 = vmatprep.subr.bf16.mxu1 %v494_v40 }
  0x19   :  { %497 = vmatpush3.bf16.msra.mxu1 %v496_v46 }
  0x1a   :  { %499 = vmatprep.subr.bf16.mxu1 %v498_v47 }
  0x1d   :  { %501 = vmatpush3.bf16.msra.mxu1 %v500_v52 }
  0x1e   :  { %503 = vmatprep.subr.bf16.mxu1 %v502_v53 }
  0x21   :  { %505 = vmatpush3.bf16.msra.mxu1 %v504_v56 }
  0x24   :  { %224 = vmatmul.mubr.f32.vlgmr.msra.gmra.mrb[0].mxu1 %v118_v57 }
  0xe5   :  { %v455_v59 = vpop.f32.mrb[0].mxu0 }
  0xe6   :  { %v109_v60 = vpop.f32.mrb[1].mxu0  ;;  %v115_v5 = vadd.f32 %v455_v59, %v391_v1 }
  0xe7   :  { %v110_v3 = vadd.f32 %v391_v1, %v109_v60 }
  0xf7   :  { %v438_v61 = vpop.f32.mrb[0].mxu1 }
  0xf8   :  { %v439_v63 = vpop.f32.mrb[1].mxu1 }
  0xf9   :  { %v440_v0 = vadd.f32 %v439_v63, %v438_v61 }
  0xfb   :  { %v226_v2 = vadd.f32 %v440_v0, %v394_v62 }
  0xfd   :  { %457 = vmatpush3.xpose.msk.msra.mxu0 %vm36_vm0, %v226_v2  ;;  %v308_v4 = vrot.slane %v226_v2, 3 }
  0xfe   :  { %461 = vmatprep.subr.mxu0 %v508_v58 }
 0x100   :  { %459 = vmatmul.mubr.msk.f32.vlgmr.msra.gmra.mrb[2].mxu0 %vm36_vm0, %v110_v3 }
 0x101   :  { %462 = vmatpush3.xpose.msk.msra.mxu0 %vm36_vm0, %v308_v4  ;;  %463 = vmatprep.mubr.msk.f32.mxu0 %vm509_vm1, %v508_v58 }
 0x104   :  { %464 = vmatmul.mubr.msk.f32.vlgmr.msra.gmra.mrb[4].mxu0 %vm36_vm0, %v115_v5 }
 0x1d3   :  { %v301_v6 = vpop.f32.mrb[2].mxu0 }
 0x1d4   :  { %v305_v7 = vmul.f32 0.17677669, %v301_v6  ;;  %v460_v8 = vpop.f32.mrb[3].mxu0 }
 0x1d6   :  { %307 = vst.msk [vmem:[%s691_s6] sm:$0xff] %vm306_vm2, %v305_v7 }
 0x1d7   :  { %v380_v9 = vpop.f32.mrb[4].mxu0 }
 0x1d8   :  { %v384_v10 = vmul.f32 0.17677669, %v380_v9  ;;  %v465_v11 = vpop.f32.mrb[5].mxu0 }
 0x1da   :  { %399 = vst.msk [vmem:[%s691_s6 + $0x8] sm:$0xff] %vm306_vm2, %v384_v10 }

</bundles_post_ra>
